<compile_context>
chip_gen: v6e
topology: v6e:2x2x1
jax: 0.10.0
libtpu: 0.0.40
codegen_flags: <defaults>
</compile_context>

<pallas_src>
import functools

import jax
import jax.numpy as jnp
import numpy as np
from jax import lax
from jax.experimental import pallas as pl
from jax.experimental.pallas import tpu as pltpu


def _round_up(v, m):
    return -(-v // m) * m


def _gating_kernel(x_ref, w_ref, o_ref, *, eps, inv_count, compute_dtype):
    """1x1x1 Conv3d + InstanceNorm3d (no affine) + ReLU for one (sample, Cout-tile).

    x_ref: [Cin, S_pad]   native HBM dtype (f32 or bf16), S_pad = round_up(D*H*W, 128)
    w_ref: [TC,  Cin]     native weight dtype
    o_ref: [TC,  S_pad]   out_dtype (default bf16)
    """
    # Cast to the MXU compute dtype in-register (no standalone HBM convert).
    x = x_ref[...].astype(compute_dtype)
    w = w_ref[...].astype(compute_dtype)

    # 1x1x1 conv == per-voxel channel projection: one MXU matmul, f32 accumulate.
    conv = jnp.dot(w, x, preferred_element_type=jnp.float32)          # [TC, S_pad]

    # InstanceNorm3d stats in a single sweep: sum and sum-of-squares lane
    # reductions.  Zero-padded spatial lanes contribute exactly 0 (no bias), so
    # dividing by the true voxel count (inv_count = 1/S) keeps stats exact.
    s1 = jnp.sum(conv, axis=1, keepdims=True)                         # [TC, 1]
    s2 = jnp.sum(conv * conv, axis=1, keepdims=True)                  # [TC, 1]
    mean = s1 * inv_count
    var = jnp.maximum(s2 * inv_count - mean * mean, 0.0)              # biased, clamped >= 0
    scale = lax.rsqrt(var + eps)                                      # EUP
    shift = -mean * scale

    # Single normalise + ReLU + cast + store sweep (lane-dense tile).
    o_ref[...] = jnp.maximum(conv * scale + shift, 0.0).astype(o_ref.dtype)


def unet_grid_gating_signal3(x, weight, bias=None, *, eps=1e-5,
                             compute_dtype=jnp.bfloat16,
                             out_dtype=jnp.bfloat16):
    """Forward pass of UnetGridGatingSignal3 with its default configuration
    (kernel_size=(1,1,1), stride 1, padding 0, is_batchnorm=True, gate_flag=False).

    x:      [N, Cin, D, H, W]   (NCDHW, PyTorch layout), f32 or bf16
    weight: [Cout, Cin, 1, 1, 1]
    bias:   [Cout] or None. Accepted for API parity but unused: a per-channel
            bias is exactly cancelled by InstanceNorm's per-(n, c) mean
            subtraction, so dropping it is mathematically exact.
    Returns [N, Cout, D, H, W] in `out_dtype` (default bf16; pass jnp.float32
    for full-precision output).
    """
    del bias  # exactly cancelled by the instance-norm mean subtraction

    N, Cin, D, H, W = x.shape
    Cout = weight.shape[0]
    if tuple(weight.shape[1:]) != (Cin, 1, 1, 1):
        # TODO(synk): general kernel_size != (1,1,1) would need a taps loop /
        # halo BlockSpec; the module default (and typical gating use) is 1x1x1.
        raise NotImplementedError("only kernel_size=(1,1,1) is supported")

    S = D * H * W
    S_pad = _round_up(S, 128)          # lane-dense, unmasked stores

    # Contiguous reshape only; NO dtype cast here (cast happens in-kernel).
    x2 = x.reshape(N, Cin, S)
    if S_pad != S:
        x2 = jnp.pad(x2, ((0, 0), (0, 0), (0, S_pad - S)))

    # Cout padding (sublanes) + Cout tile choice.
    Cout_pad = _round_up(Cout, 8)
    if Cout_pad <= 256:
        tc = Cout_pad
    else:
        Cout_pad = _round_up(Cout_pad, 256)
        tc = 256

    x_b = jnp.dtype(x.dtype).itemsize
    w_b = jnp.dtype(weight.dtype).itemsize
    o_b = jnp.dtype(out_dtype).itemsize

    def _footprint(t):
        return (2 * Cin * S_pad * x_b        # double-buffered x block
                + 2 * t * Cin * w_b          # double-buffered weight block
                + 2 * t * S_pad * o_b        # double-buffered output block
                + 3 * t * S_pad * 4)         # f32 conv tile + Mosaic temps

    # Shrink the Cout tile while a step exceeds a ~40 MiB budget (stays well
    # under v7x's 64 MiB physical VMEM and default scoped limits elsewhere).
    while (tc > 8 and tc % 16 == 0 and Cout_pad % (tc // 2) == 0
           and _footprint(tc) > 40 * 1024 * 1024):
        tc //= 2
    n_ct = Cout_pad // tc

    w2 = weight.reshape(Cout, Cin)
    if Cout_pad != Cout:
        w2 = jnp.pad(w2, ((0, Cout_pad - Cout), (0, 0)))

    vmem_limit = int(min(max(_footprint(tc) * 3 // 2 + (1 << 20), 16 << 20),
                         56 << 20))

    cost = pl.CostEstimate(
        flops=2 * N * S_pad * Cin * Cout_pad,
        transcendentals=N * Cout_pad,                      # one rsqrt per (n, c)
        bytes_accessed=(N * Cin * S_pad * x_b
                        + Cout_pad * Cin * w_b
                        + N * Cout_pad * S_pad * o_b),
    )

    out = pl.pallas_call(
        functools.partial(_gating_kernel, eps=eps, inv_count=1.0 / S,
                          compute_dtype=compute_dtype),
        out_shape=jax.ShapeDtypeStruct((N, Cout_pad, S_pad), out_dtype),
        grid=(N, n_ct),
        in_specs=[
            # x block is constant over the Cout axis -> stays resident, no re-DMA.
            pl.BlockSpec((None, Cin, S_pad), lambda n, j: (n, 0, 0)),
            pl.BlockSpec((tc, Cin), lambda n, j: (j, 0)),
        ],
        out_specs=pl.BlockSpec((None, tc, S_pad), lambda n, j: (n, j, 0)),
        compiler_params=pltpu.CompilerParams(
            dimension_semantics=("parallel", "parallel"),  # megacore on either axis
            vmem_limit_bytes=vmem_limit),
        cost_estimate=cost,
    )(x2, w2)

    # Strip channel / spatial padding; channel-major output already matches NCDHW.
    return out[:, :Cout, :S].reshape(N, Cout, D, H, W)


def _reference(x, weight, bias, eps=1e-5):
    """Pure-JAX f32 reference matching PyTorch:
    Conv3d(1x1x1, with bias) -> InstanceNorm3d(affine=False) -> ReLU."""
    N, Cin, D, H, W = x.shape
    Cout = weight.shape[0]
    w2 = weight.reshape(Cout, Cin).astype(jnp.float32)
    conv = jnp.einsum("oc,ncdhw->nodhw", w2, x.astype(jnp.float32))
    conv = conv + bias.reshape(1, Cout, 1, 1, 1).astype(jnp.float32)
    mean = jnp.mean(conv, axis=(2, 3, 4), keepdims=True)
    var = jnp.mean((conv - mean) ** 2, axis=(2, 3, 4), keepdims=True)
    y = (conv - mean) / jnp.sqrt(var + eps)
    return jnp.maximum(y, 0.0)


if __name__ == "__main__":
    # UnetGridGatingSignal3 defaults: 1x1x1 conv, InstanceNorm3d, ReLU.
    N, Cin, Cout = 2, 4, 8
    D, H, W = 4, 8, 8                       # S = D*H*W = 256 (2 lane-widths)

    key = jax.random.PRNGKey(0)
    kx, kw, kb = jax.random.split(key, 3)

    x = jax.random.normal(kx, (N, Cin, D, H, W), jnp.float32)

    # Kaiming-normal conv weight (fan_in = Cin*1*1*1), PyTorch-default uniform bias.
    fan_in = Cin
    weight = jax.random.normal(kw, (Cout, Cin, 1, 1, 1), jnp.float32) * np.sqrt(2.0 / fan_in)
    bound = 1.0 / np.sqrt(fan_in)
    bias = jax.random.uniform(kb, (Cout,), jnp.float32, -bound, bound)

    ref = _reference(x, weight, bias)

    # Production setting: bf16 MXU operands, bf16 output (all casts in-kernel).
    out_bf16 = unet_grid_gating_signal3(x, weight, bias)
    out_bf16 = jax.block_until_ready(out_bf16)
    np.testing.assert_allclose(np.asarray(jnp.asarray(out_bf16, jnp.float32)),
                               np.asarray(ref), rtol=3e-2, atol=3e-2)

    # f32 operands + f32 output: tight check against the PyTorch-semantics ref.
    out_f32 = unet_grid_gating_signal3(x, weight, bias,
                                       compute_dtype=jnp.float32,
                                       out_dtype=jnp.float32)
    out_f32 = jax.block_until_ready(out_f32)
    np.testing.assert_allclose(np.asarray(out_f32), np.asarray(ref),
                               rtol=2e-3, atol=2e-3)

    # Exercise the padding paths: S = 3*5*7 = 105 (not a multiple of 128) and
    # Cout = 6 (not a multiple of 8) -- stats must still be exact.
    D2, H2, W2, Cout2 = 3, 5, 7, 6
    x3 = jax.random.normal(kx, (N, Cin, D2, H2, W2), jnp.float32)
    w3 = jax.random.normal(kw, (Cout2, Cin, 1, 1, 1), jnp.float32) * np.sqrt(2.0 / fan_in)
    b3 = jax.random.uniform(kb, (Cout2,), jnp.float32, -bound, bound)
    ref3 = _reference(x3, w3, b3)
    out3 = unet_grid_gating_signal3(x3, w3, b3,
                                    compute_dtype=jnp.float32,
                                    out_dtype=jnp.float32)
    out3 = jax.block_until_ready(out3)
    np.testing.assert_allclose(np.asarray(out3), np.asarray(ref3),
                               rtol=2e-3, atol=2e-3)

    print("KERNEL_OK")
</pallas_src>

<mosaic_0001>
module attributes {stable_mosaic.version = 11 : i64} {
  func.func @_gating_kernel(%arg0: i32, %arg1: i32, %arg2: memref<1x4x256xf32, #tpu.memory_space<vmem>>, %arg3: memref<8x4xf32, #tpu.memory_space<vmem>>, %arg4: memref<1x8x256xbf16, #tpu.memory_space<vmem>>) attributes {dimension_semantics = [#tpu.dimension_semantics<parallel>, #tpu.dimension_semantics<parallel>], iteration_bounds = array<i64: 2, 1>, scalar_prefetch = 0 : i64, scratch_operands = 0 : i64, tpu.core_type = #tpu.core_type<tc>, window_params = [{transform_indices = @transform_0, window_bounds = array<i64: 1, 4, 256>}, {transform_indices = @transform_1, window_bounds = array<i64: 8, 4>}, {transform_indices = @transform_2, window_bounds = array<i64: 1, 8, 256>}]} {
    %c0 = arith.constant 0 : index
    %c0_0 = arith.constant 0 : index
    %c0_1 = arith.constant 0 : index
    %0 = vector.load %arg2[%c0, %c0_0, %c0_1] : memref<1x4x256xf32, #tpu.memory_space<vmem>>, vector<1x4x256xf32>
    %1 = vector.shape_cast %0 : vector<1x4x256xf32> to vector<4x256xf32>
    %2 = arith.truncf %1 : vector<4x256xf32> to vector<4x256xbf16>
    %c0_2 = arith.constant 0 : index
    %c0_3 = arith.constant 0 : index
    %3 = vector.load %arg3[%c0_2, %c0_3] : memref<8x4xf32, #tpu.memory_space<vmem>>, vector<8x4xf32>
    %4 = arith.truncf %3 : vector<8x4xf32> to vector<8x4xbf16>
    %cst = arith.constant dense<0.000000e+00> : vector<8x256xf32>
    %5 = tpu.matmul %4, %2, %cst {dimension_numbers = #tpu.dot_dimension_numbers<[1], [0], [0], [1], [0, 0, 1, 1], [], []>} : vector<8x4xbf16>, vector<4x256xbf16>, vector<8x256xf32> -> vector<8x256xf32>
    %cst_4 = arith.constant dense<0.000000e+00> : vector<8xf32>
    %6 = vector.multi_reduction <add>, %5, %cst_4 [1] : vector<8x256xf32> to vector<8xf32>
    %7 = vector.shape_cast %6 : vector<8xf32> to vector<8x1xf32>
    %8 = arith.mulf %5, %5 : vector<8x256xf32>
    %cst_5 = arith.constant dense<0.000000e+00> : vector<8xf32>
    %9 = vector.multi_reduction <add>, %8, %cst_5 [1] : vector<8x256xf32> to vector<8xf32>
    %10 = vector.shape_cast %9 : vector<8xf32> to vector<8x1xf32>
    %cst_6 = arith.constant 3.906250e-03 : f32
    %11 = vector.broadcast %cst_6 : f32 to vector<8x1xf32>
    %12 = arith.mulf %7, %11 : vector<8x1xf32>
    %cst_7 = arith.constant 3.906250e-03 : f32
    %13 = vector.broadcast %cst_7 : f32 to vector<8x1xf32>
    %14 = arith.mulf %10, %13 : vector<8x1xf32>
    %15 = arith.mulf %12, %12 : vector<8x1xf32>
    %16 = arith.subf %14, %15 : vector<8x1xf32>
    %cst_8 = arith.constant 0.000000e+00 : f32
    %17 = vector.broadcast %cst_8 : f32 to vector<8x1xf32>
    %18 = arith.maximumf %16, %17 : vector<8x1xf32>
    %cst_9 = arith.constant 9.99999974E-6 : f32
    %19 = vector.broadcast %cst_9 : f32 to vector<8x1xf32>
    %20 = arith.addf %18, %19 : vector<8x1xf32>
    %21 = math.rsqrt %20 : vector<8x1xf32>
    %cst_10 = arith.constant 0.000000e+00 : f32
    %22 = vector.broadcast %cst_10 : f32 to vector<8x1xf32>
    %23 = arith.subf %22, %12 : vector<8x1xf32>
    %24 = arith.mulf %23, %21 : vector<8x1xf32>
    %25 = vector.broadcast %21 : vector<8x1xf32> to vector<8x256xf32>
    %26 = arith.mulf %5, %25 : vector<8x256xf32>
    %27 = vector.broadcast %24 : vector<8x1xf32> to vector<8x256xf32>
    %28 = arith.addf %26, %27 : vector<8x256xf32>
    %cst_11 = arith.constant 0.000000e+00 : f32
    %29 = vector.broadcast %cst_11 : f32 to vector<8x256xf32>
    %30 = arith.maximumf %28, %29 : vector<8x256xf32>
    %31 = arith.truncf %30 : vector<8x256xf32> to vector<8x256xbf16>
    %c0_12 = arith.constant 0 : index
    %c0_13 = arith.constant 0 : index
    %c0_14 = arith.constant 0 : index
    %32 = vector.load %arg4[%c0_12, %c0_13, %c0_14] : memref<1x8x256xbf16, #tpu.memory_space<vmem>>, vector<1x8x256xbf16>
    %33 = vector.shape_cast %32 : vector<1x8x256xbf16> to vector<8x256xbf16>
    %34 = vector.shape_cast %31 : vector<8x256xbf16> to vector<1x8x256xbf16>
    tpu.vector_store %arg4[%c0_12, %c0_13, %c0_14], %34 {strides = array<i32>} : memref<1x8x256xbf16, #tpu.memory_space<vmem>>, vector<1x8x256xbf16>,
    return
  }
  func.func @transform_0(%arg0: i32, %arg1: i32) -> (i32, i32, i32) {
    %c0_i32 = arith.constant 0 : i32
    %c0_i32_0 = arith.constant 0 : i32
    %c0_i32_1 = arith.constant 0 : i32
    return %arg0, %c0_i32, %c0_i32_0 : i32, i32, i32
  }
  func.func @transform_1(%arg0: i32, %arg1: i32) -> (i32, i32) {
    %c0_i32 = arith.constant 0 : i32
    %c0_i32_0 = arith.constant 0 : i32
    return %arg1, %c0_i32 : i32, i32
  }
  func.func @transform_2(%arg0: i32, %arg1: i32) -> (i32, i32, i32) {
    %c0_i32 = arith.constant 0 : i32
    %c0_i32_0 = arith.constant 0 : i32
    return %arg0, %arg1, %c0_i32 : i32, i32, i32
  }
}

</mosaic_0001>

<bundles_post_ra>
// kernel: tpu_custom_call.1
= control target key start
LH: loop header
LB: loop body
LE: loop exit
PB: predicated region body
PF: predicated region fallthrough
CT: control target
= control target key end

     0   :  { %7 = vsyncpa [#allocation3], 0  ;;  %s754_s0 = inlined_call_operand.hbm [shape: f32[2,4,256], index: 0, kind: input, shape index: {}]   ;;  %s755_s1 = inlined_call_operand.vmem [shape: f32[8,4], index: 1, kind: input, shape index: {}]   ;;  %s756_s2 = inlined_call_operand.hbm [shape: bf16[2,8,256], index: 2, kind: output, shape index: {}]  }
   0x1   :  { %9 = vsyncpa [#allocation3 + $0x1], 0 }
   0x2   :  { %10 = vsyncpa [#allocation4], 0 }
   0x3   :  { %12 = vsyncpa [#allocation4 + $0x1], 0  ;;  %s613_s9 = smov 0   ;;  %s615_s10 = smov 0  }
   0x4   :  { %s617_s11 = smov 0   ;;  %s619_s12 = smov 0  }
   0x5   :  { %s621_s13 = smov 0   ;;  %s623_s14 = smov 0  }
   0x6 LB: > { %s397_s15 = sadd.s32 4294967295, %s593_s14   ;;  %s398_s16 = sadd.s32 4294967294, %s593_s14   ;;  %s593_s14 = sphi %s623_s14, %s18_s14   ;;  %s589_s13 = sphi %s621_s13, %s768_s13   ;;  %s585_s12 = sphi %s619_s12, %s767_s12   ;;  %s581_s11 = sphi %s617_s11, %s766_s11   ;;  %s577_s10 = sphi %s615_s10, %s765_s10   ;;  %s573_s9 = sphi %s613_s9, %s764_s9  }
   0x7   : > { %s30_s17 = sadd.s32 1, %s589_s13  ;;  %s37_s18 = sadd.s32 1, %s581_s11 }
   0x8   : > { %p32_p0 = scmp.ge.s32.totalorder %s30_s17, 2  ;;  %p44_p1 = scmp.ne.s32.totalorder %s581_s11, %s577_s10 }
   0x9   : > { %p45_p2 = scmp.eq.s32.totalorder %s593_s14, 0  ;;  %p50_p3 = scmp.ne.s32.totalorder %s577_s10, %s573_s9 }
   0xa   : > { %s770_s17 = smov (%p32_p0, %s30_s17), 0  ;;  %p51_p5 = scmp.eq.s32.totalorder %s397_s15, 0 }
   0xb   : > { %p654_p4 = por %p45_p2, %p44_p1  ;;  %s34_s20 = ssub.s32 %s589_s13, %s770_s17 }
   0xc   : > { %p102_p6 = scmp.eq.s32.totalorder %s397_s15, 1  ;;  %p35_p7 = scmp.eq.s32.totalorder %s34_s20, 0 }
   0xd   : > { %p660_p8 = por %p51_p5, %p50_p3  ;;  %p108_p10 = scmp.eq.s32.totalorder %s398_s16, 1 }
   0xe   : > { %p664_p9 = por %p102_p6, %p44_p1  ;;  %p431_p13 = scmp.lt.s32.totalorder %s593_s14, 2 }
   0xf   : > { %s669_s23 = scalar_select %p35_p7, %s581_s11, %s37_s18  }
  0x10   : > { %p671_p11 = por %p108_p10, %p50_p3  ;;  %s135_s25 = sand.u32 1, %s581_s11  }
  0x11   : > { %s402_s26 = sshll.u32 %s135_s25, 3  ;;  %s416_s27 = sshll.u32 %s589_s13, 7 }
  0x12   : > { %s760_s24 = scalar_select %p671_p11, 1, 0 }
  0x13   : > { %s145_s30 = scalar_lea.hbm %s754_s0, %s416_s27  ;;  %s139_s3 = scalar_lea.vmem [#allocation2], %s402_s26 }
  0x14   : > { %s147_s4 = sshll.u32 %s139_s3, 4  ;;  %p684_p0 = pnand %p431_p13, %p654_p4  ;;  %s148_s4 = int_to_ptr.vmem [resolvable:$true] %s147_s4 }
  0x15   : > { %p405_p1 = scmp.ge.s32.totalorder %s593_s14, 1  ;;  %p152_p2 = scmp.lt.s32.totalorder %s593_s14, 3 }
  0x16   : > { %s136_s6 = scalar_lea.sflag [#allocation3], %s135_s25  ;;  %p487_p3 = pneg %p684_p0 }
  0x17   : > { %s498_s7 = scalar_lea.vmem %s148_s4, 128  ;;  %s595_s8 = smov [#allocation2]  }
  0x18   : > { %p499_p5 = scmp.ne.s32.totalorder %s148_s4, %s498_s7  ;;  %s503_s15 = sshll.u32 %s595_s8, 4  ;;  %s504_s15 = int_to_ptr.vmem [resolvable:$false] %s503_s15 }
  0x19   : > { %s505_s16 = scalar_lea.vmem %s504_s15, 256  ;;  %p506_p10 = scmp.lt.s32.totalorder %s148_s4, %s504_s15 }
  0x1a   : > { %p501_p6 = pnand %p499_p5, %p487_p3  ;;  %p507_p12 = scmp.lt.s32.totalorder %s505_s16, %s498_s7 }
  0x1c   : > { %p502_p7 = pneg %p501_p6  ;;  %p508_p4 = por %p507_p12, %p506_p10 }
  0x1e   : > { %p509_p13 = pnand %p508_p4, %p502_p7 }
  0x20   : > { %512 = shalt.err (!%p509_p13)
}
  0x21   : > { %426 = dma.hbm_to_vmem [thread:$0]  (!%p684_p0), %s145_s30, 128, %s148_s4, %s136_s6  }
  0x22   : > { %p153_p11 = pnand %p405_p1, %p152_p2 }
  0x23   : > { %s699_s18 = sand.u32 (!%p153_p11), 1, %s577_s10  }
  0x24   : > { %156 = sbr.rel (%p153_p11) target bundleno = 433 (0x1b1), region = 28  ;;  %s406_s19 = sshll.u32 (!%p153_p11), %s699_s18, 3 }
  0x25   : > { %s159_s20 = scalar_lea.sflag (!%p153_p11), [#allocation3], %s699_s18  ;;  %s162_s25 = scalar_lea.vmem (!%p153_p11), [#allocation2], %s406_s19 }
  0x29   : > { %564 = dma.done.wait (%p660_p8), %s159_s20, 128  }
  0x2a   : > { %566 = vsyncadd (%p660_p8), %s159_s20, 4294967168  ;;  %v596_v0 = vmov 0   ;;  %v192_v1 = vld [vmem:[%s162_s25] sm:$0xff]  ;;  %vm204_vm0 = vcmask 1041408   ;;  %vm200_vm1 = vcmask 31744   ;;  %s418_s21 = sshll.u32 %s585_s12, 7 }
  0x2b   : > { %243 = vmatprep.mubr.bf16.mxu0 %v596_v0  ;;  %v194_v2 = vcombine.high %v192_v1, %v192_v1  ;;  %v196_v3 = vpack.c.bf16 %v192_v1, %v192_v1  ;;  %v198_v4 = vld [vmem:[%s755_s1] sm:$0xff]  ;;  %s186_s28 = scalar_lea.vmem [#allocation5], %s406_s19  ;;  %s299_s4 = scalar_lea.hbm %s756_s2, %s418_s21 }
  0x2c   : > { %v199_v7 = vpack.c.bf16 %v198_v4, %v198_v4  ;;  %s301_s29 = sshll.u32 %s186_s28, 4  ;;  %s285_s5 = scalar_lea.sflag [#allocation4], %s699_s18  ;;  %s302_s29 = int_to_ptr.vmem [resolvable:$true] %s301_s29 }
  0x2d   : > { %v197_v5 = vpack.c.bf16 %v194_v2, %v194_v2  ;;  %v206_v6 = vsel %vm204_vm0, %v196_v3, 0  ;;  %s513_s6 = scalar_lea.vmem %s302_s29, 128  ;;  %s597_s7 = smov [#allocation5]  }
  0x2e   : > { %p514_p8 = scmp.ne.s32.totalorder %s302_s29, %s513_s6  ;;  %s517_s12 = sshll.u32 %s597_s7, 4  ;;  %s518_s12 = int_to_ptr.vmem [resolvable:$false] %s517_s12 }
  0x2f   : > { %408 = vmatprep.subr.msk.bf16.mxu0 %vm204_vm0, %v197_v5  ;;  %s519_s8 = scalar_lea.vmem %s518_s12, 256  ;;  %p520_p0 = scmp.lt.s32.totalorder %s302_s29, %s518_s12 }
  0x30   : > { %226 = vmatpush1.bf16.msra.mxu0 %v206_v6  ;;  %p515_p11 = pnand %p514_p8, %p664_p9  ;;  %p521_p1 = scmp.lt.s32.totalorder %s519_s8, %s513_s6 }
  0x32   : > { %p516_p12 = pneg %p515_p11  ;;  %p522_p2 = por %p521_p1, %p520_p0 }
  0x33   : > { %409 = vmatmul.mubr.msk.bf16.vlgmr.msra.gmra.mxu0 %vm200_vm1, %v199_v7 }
  0x34   : > { %p523_p3 = pnand %p522_p2, %p516_p12 }
  0xf3   : > { %v245_v8 = vpop.f32.mrf.mxu0 }
  0xf4   : > { %v255_v13 = vmul.f32 %v245_v8, %v245_v8 }
  0xf5   : > { %v247_v9 = vpop.f32.mrf.mxu0 }
  0xf6   : > { %v252_v10 = vadd.f32 %v247_v9, %v245_v8  ;;  %v256_v11 = vmul.f32 %v247_v9, %v247_v9 }
  0xf7   : > { %v249_v12 = vpop.f32.mrf.mxu0 }
  0xf8   : > { %253 = vadd.xlane.f32.xlu0 %v252_v10  ;;  %v257_v15 = vadd.f32 %v256_v11, %v255_v13 }
  0xf9   : > { %v250_v14 = vpop.f32.mrf.mxu0 }
  0xfc   : > { %258 = vadd.xlane.f32.xlu0 %v257_v15 }
 0x181   : > { %v254_v16 = vpop.xlane.xlu0 %253 }
 0x182   : > { %v260_v17 = vmul.f32 0.00390625, %v254_v16 }
 0x184   : > { %v262_v19 = vmul.f32 %v260_v17, %v260_v17  ;;  %v267_v24 = vsub.f32 0.0, %v260_v17 }
 0x185   : > { %v259_v18 = vpop.xlane.xlu0 %258 }
 0x186   : > { %v261_v20 = vmul.f32 0.00390625, %v259_v18 }
 0x188   : > { %v263_v21 = vsub.f32 %v261_v20, %v262_v19 }
 0x18a   : > { %v264_v22 = vmax.f32 %v263_v21, 0.0 }
 0x18c   : > { %v265_v23 = vadd.f32 1e-05, %v264_v22 }
 0x18e   : > { %483 = vrsqrt.f32 %v265_v23 }
 0x19b   : > { %v484_v25 = vpop.eup %483 }
 0x19c   : > { %v268_v26 = vmul.f32 %v484_v25, %v267_v24  ;;  %v269_v27 = vmul.f32 %v484_v25, %v245_v8  ;;  %v270_v28 = vmul.f32 %v484_v25, %v247_v9 }
 0x19e   : > { %v271_v29 = vadd.f32 %v269_v27, %v268_v26  ;;  %v272_v30 = vadd.f32 %v270_v28, %v268_v26 }
 0x1a0   : > { %v273_v31 = vmax.f32 %v271_v29, 0.0  ;;  %v274_v32 = vmax.f32 %v272_v30, 0.0 }
 0x1a2   : > { %v417_v33 = vpack.c.bf16 %v274_v32, %v273_v31 }
 0x1a4   : > { %283 = vst [vmem:[%s186_s28] sm:$0xff] %v417_v33 }
 0x1a5   : > { %526 = shalt.err (!%p523_p3)
}
 0x1a6   : > { %s527_s15 = scalar_lea.hbm %s299_s4, 128  ;;  %s531_s19 = scalar_lea.hbm %s756_s2, 256 }
 0x1a7   : > { %p528_p5 = scmp.ne.s32.totalorder %s299_s4, %s527_s15  ;;  %p532_p10 = scmp.lt.s32.totalorder %s299_s4, %s756_s2 }
 0x1a8   : > { %p533_p4 = scmp.lt.s32.totalorder %s531_s19, %s527_s15 }
 0x1a9   : > { %p529_p6 = pnand %p528_p5, %p664_p9 }
 0x1aa   : > { %p534_p13 = por %p533_p4, %p532_p10 }
 0x1ab   : > { %p530_p7 = pneg %p529_p6 }
 0x1ad   : > { %p535_p8 = pnand %p534_p13, %p530_p7 }
 0x1af   : > { %538 = shalt.err (!%p535_p8)
}
 0x1b0   : > { %421 = dma.vmem_to_hbm [thread:$0]  (%p664_p9), %s302_s29, 128, %s299_s4, %s285_s5  }
 0x1b1 PF: > { %s313_s26 = sand.u32 1, %s573_s9   ;;  %p762_p11 = scmp.ne.s32.totalorder %s760_s24, 0 }
 0x1b2   : > { %p763_p12 = scmp.ge.s32.totalorder %s593_s14, 2  ;;  %s314_s27 = scalar_lea.sflag [#allocation4], %s313_s26 }
 0x1b4   : > { %p428_p0 = pnand %p763_p12, %p762_p11 }
 0x1b6   : > { %p429_p1 = pneg %p428_p0 }
 0x1b8   : > { %568 = dma.done.wait (%p429_p1), %s314_s27, 128  }
 0x1b9   : > { %570 = vsyncadd (%p429_p1), %s314_s27, 4294967168  ;;  %s18_s14 = sadd.s32 1, %s593_s14   ;;  %s764_s9 = smov %s577_s10 }
 0x1ba   : > { %p15_p2 = scmp.ge.s32.totalorder %s18_s14, 4   ;;  %s765_s10 = smov %s581_s11 }
 0x1bb   : > { %s766_s11 = smov %s669_s23  ;;  %s767_s12 = smov %s589_s13 }
 0x1bc   : > { %s768_s13 = smov %s770_s17  ;;  %17 = sbr.rel (!%p15_p2) target bundleno = 6 (0x6), region = 76 }
 0x1c1   :  { %319 = vsyncpa [#allocation3], 1 }
 0x1c2   :  { %321 = vsyncpa [#allocation3 + $0x1], 1 }
 0x1c3   :  { %322 = vsyncpa [#allocation4], 1 }
 0x1c4   :  { %324 = vsyncpa [#allocation4 + $0x1], 1 }

</bundles_post_ra>
